<compile_context>
chip_gen: v6e
topology: v6e:2x2x1
jax: 0.10.0
libtpu: 0.0.40
codegen_flags: <defaults>
</compile_context>

<pallas_src>
import jax
import jax.numpy as jnp
from jax.experimental import pallas as pl
from jax.experimental.pallas import tpu as pltpu

_LANE = 128                    # batch rows per sublane-row (lane width)
_MAX_ROWS_PER_STEP = 4096      # sublane-rows per grid step -> 512K batch rows / step
_MIN_PALLAS_BATCH = 64 * 1024  # below this, plain jnp beats kernel launch + plumbing


def _cdiv(a, b):
    return -(-a // b)


def _round_up(a, m):
    return _cdiv(a, m) * m


def _collapsed_affine_sigmoid_kernel(b_ref, x_ref, s_ref, o_ref):
    # b_ref: SMEM (1,)         collapsed bias
    # x_ref: VMEM (rows, 256)  128 batch rows per sublane-row, 2 features interleaved on lanes
    # s_ref: VMEM (256, 128)   lane-compaction matrix carrying the collapsed weights
    # o_ref: VMEM (rows, 128)  lane-dense sigmoid output
    z = jnp.dot(
        x_ref[...], s_ref[...],
        preferred_element_type=jnp.float32,
        precision=jax.lax.Precision.HIGHEST,  # full f32 accuracy; MXU is idle -> free
    ) + b_ref[0]
    # Exact reciprocal to stay within 1e-5 of the reference; approx=True is fine when
    # the accuracy budget allows (the kernel is HBM-bound either way).
    o_ref[...] = pl.reciprocal(1.0 + jnp.exp(-z), approx=False)


def simple_torch_model_forward(x, w1, b1, w2, b2, *, min_pallas_batch=_MIN_PALLAS_BATCH):
    """x: (B, 2) f32; w1: (2, 4); b1: (4,); w2: (4, 1); b2: (1,) -> (B, 1) f32."""
    B = x.shape[0]
    x32 = x.astype(jnp.float32)

    # Collapse Linear(2,4) -> Linear(4,1) (exact affine composition).
    w1f, b1f = w1.astype(jnp.float32), b1.astype(jnp.float32)
    w2f, b2f = w2.astype(jnp.float32), b2.astype(jnp.float32)
    w_c = (w1f @ w2f).reshape(2)        # (2,)
    b_c = (b1f @ w2f + b2f).reshape(1)  # (1,)

    # Small-batch fallback: XLA fuses this; pallas_call overhead would dominate.
    if B < min_pallas_batch:
        return jax.nn.sigmoid(x32 @ w_c.reshape(2, 1) + b_c)

    # Row-major lane-dense view: (n_rows, 256).  Reshape is a free contiguous view;
    # padding (to the next multiple of 128 batch rows) only when B is unaligned.
    n_rows = _cdiv(B, _LANE)
    padded_B = n_rows * _LANE
    if padded_B != B:
        x32 = jnp.pad(x32, ((0, padded_B - B), (0, 0)))
    x2d = x32.reshape(n_rows, 2 * _LANE)

    # Lane-compaction matrix: S[2j, j] = w_c0, S[2j+1, j] = w_c1.
    eye = jnp.eye(_LANE, dtype=jnp.float32)
    sel = jnp.stack([eye * w_c[0], eye * w_c[1]], axis=1).reshape(2 * _LANE, _LANE)

    # Tile selection: big tiles (grid overhead << DMA time), >= 2 even steps so the
    # "parallel" axis shards across both TensorCores on v7x, rows multiple of 8.
    n_steps = max(2, _cdiv(n_rows, _MAX_ROWS_PER_STEP))
    n_steps += n_steps % 2
    rows_per_step = _round_up(_cdiv(n_rows, n_steps), 8)
    if rows_per_step >= n_rows:
        rows_per_step, n_steps = n_rows, 1          # single full-extent block
    else:
        n_steps = _cdiv(n_rows, rows_per_step)      # trailing block may be partial

    x_block_bytes = rows_per_step * 2 * _LANE * 4
    o_block_bytes = rows_per_step * _LANE * 4
    sel_bytes = 2 * _LANE * _LANE * 4
    vmem_limit = int(max(2 * (x_block_bytes + o_block_bytes + sel_bytes) + (2 << 20),
                         16 << 20))

    out = pl.pallas_call(
        _collapsed_affine_sigmoid_kernel,
        out_shape=jax.ShapeDtypeStruct((n_rows, _LANE), jnp.float32),
        grid=(n_steps,),
        in_specs=[
            # Tiny collapsed bias lives whole in SMEM (no VMEM double-buffering).
            pl.BlockSpec(memory_space=pltpu.MemorySpace.SMEM),
            pl.BlockSpec((rows_per_step, 2 * _LANE), lambda i: (i, 0)),
            # Constant block index -> stays resident in VMEM across grid steps.
            pl.BlockSpec((2 * _LANE, _LANE), lambda i: (0, 0)),
        ],
        out_specs=pl.BlockSpec((rows_per_step, _LANE), lambda i: (i, 0)),
        compiler_params=pltpu.CompilerParams(
            dimension_semantics=("parallel",),
            vmem_limit_bytes=vmem_limit,
        ),
        cost_estimate=pl.CostEstimate(
            flops=5 * B, transcendentals=B, bytes_accessed=12 * B),
    )(b_c, x2d, sel)

    # (n_rows,128) -> (padded_B,) reshape is free; the slice is a no-op whenever
    # B % 128 == 0 (the common large-batch case).
    return out.reshape(-1)[:B].reshape(B, 1)


def reference_forward(x, w1, b1, w2, b2):
    h = x @ w1 + b1
    return jax.nn.sigmoid(h @ w2 + b2)


if __name__ == "__main__":
    key = jax.random.PRNGKey(0)
    k_x, k_w1, k_b1, k_w2, k_b2 = jax.random.split(key, 5)

    # nn.Linear(2, 4) / nn.Linear(4, 1) params, stored pre-transposed as (in, out).
    w1 = jax.random.normal(k_w1, (2, 4), dtype=jnp.float32) * 0.5
    b1 = jax.random.normal(k_b1, (4,), dtype=jnp.float32) * 0.1
    w2 = jax.random.normal(k_w2, (4, 1), dtype=jnp.float32) * 0.5
    b2 = jax.random.normal(k_b2, (1,), dtype=jnp.float32) * 0.1

    # 1) Tiny batch -> jnp fallback path (pallas overhead not worth it at this size).
    B = 8
    x = jax.random.normal(k_x, (B, 2), dtype=jnp.float32)
    out = jax.block_until_ready(simple_torch_model_forward(x, w1, b1, w2, b2))
    ref = reference_forward(x, w1, b1, w2, b2)
    assert out.shape == (B, 1)
    assert jnp.allclose(out, ref, atol=1e-5, rtol=1e-5)

    # 2) 128-aligned batch forced through the Pallas kernel (no padding, 2 grid steps,
    #    trailing partial block exercised).
    B2 = 2560
    x2 = jax.random.normal(k_x, (B2, 2), dtype=jnp.float32)
    out2 = jax.block_until_ready(
        simple_torch_model_forward(x2, w1, b1, w2, b2, min_pallas_batch=0))
    ref2 = reference_forward(x2, w1, b1, w2, b2)
    assert out2.shape == (B2, 1)
    assert jnp.allclose(out2, ref2, atol=1e-5, rtol=1e-5)

    # 3) Unaligned batch forced through the Pallas kernel (pad-to-128 + partial block).
    B3 = 1111
    x3 = jax.random.normal(k_x, (B3, 2), dtype=jnp.float32)
    out3 = jax.block_until_ready(
        simple_torch_model_forward(x3, w1, b1, w2, b2, min_pallas_batch=0))
    ref3 = reference_forward(x3, w1, b1, w2, b2)
    assert out3.shape == (B3, 1)
    assert jnp.allclose(out3, ref3, atol=1e-5, rtol=1e-5)

    print("KERNEL_OK")
</pallas_src>

<mosaic_0001>
module attributes {stable_mosaic.version = 11 : i64} {
  func.func @_collapsed_affine_sigmoid_kernel(%arg0: i32, %arg1: memref<1xf32, #tpu.memory_space<smem>>, %arg2: memref<16x256xf32, #tpu.memory_space<vmem>>, %arg3: memref<256x128xf32, #tpu.memory_space<vmem>>, %arg4: memref<16x128xf32, #tpu.memory_space<vmem>>) attributes {dimension_semantics = [#tpu.dimension_semantics<parallel>], iteration_bounds = array<i64: 2>, scalar_prefetch = 0 : i64, scratch_operands = 0 : i64, tpu.core_type = #tpu.core_type<tc>, window_params = [{transform_indices = @transform_0, window_bounds = array<i64: 1>}, {transform_indices = @transform_1, window_bounds = array<i64: 16, 256>}, {pipeline_mode = #tpu.pipeline_mode<synchronous>, transform_indices = @transform_2, window_bounds = array<i64: 256, 128>}, {transform_indices = @transform_3, window_bounds = array<i64: 16, 128>}]} {
    %c0 = arith.constant 0 : index
    %c0_0 = arith.constant 0 : index
    %0 = vector.load %arg2[%c0, %c0_0] : memref<16x256xf32, #tpu.memory_space<vmem>>, vector<16x256xf32>
    %c0_1 = arith.constant 0 : index
    %c0_2 = arith.constant 0 : index
    %1 = vector.load %arg3[%c0_1, %c0_2] : memref<256x128xf32, #tpu.memory_space<vmem>>, vector<256x128xf32>
    %cst = arith.constant dense<0.000000e+00> : vector<16x128xf32>
    %2 = tpu.matmul %0, %1, %cst {dimension_numbers = #tpu.dot_dimension_numbers<[1], [0], [0], [1], [0, 0, 1, 1], [], []>, precision = #tpu.contract_precision<fp32>} : vector<16x256xf32>, vector<256x128xf32>, vector<16x128xf32> -> vector<16x128xf32>
    %c0_3 = arith.constant 0 : index
    %3 = memref.load %arg1[%c0_3] : memref<1xf32, #tpu.memory_space<smem>>
    %4 = vector.broadcast %3 : f32 to vector<16x128xf32>
    %5 = arith.addf %2, %4 : vector<16x128xf32>
    %cst_4 = arith.constant 0.000000e+00 : f32
    %6 = vector.broadcast %cst_4 : f32 to vector<16x128xf32>
    %7 = arith.subf %6, %5 : vector<16x128xf32>
    %8 = math.exp %7 : vector<16x128xf32>
    %cst_5 = arith.constant 1.000000e+00 : f32
    %9 = vector.broadcast %cst_5 : f32 to vector<16x128xf32>
    %10 = arith.addf %9, %8 : vector<16x128xf32>
    %11 = tpu.reciprocal %10 : vector<16x128xf32> -> vector<16x128xf32>
    %c0_6 = arith.constant 0 : index
    %c0_7 = arith.constant 0 : index
    %12 = vector.load %arg4[%c0_6, %c0_7] : memref<16x128xf32, #tpu.memory_space<vmem>>, vector<16x128xf32>
    tpu.vector_store %arg4[%c0_6, %c0_7], %11 {strides = array<i32>} : memref<16x128xf32, #tpu.memory_space<vmem>>, vector<16x128xf32>,
    return
  }
  func.func @transform_0(%arg0: i32) -> i32 {
    %c0_i32 = arith.constant 0 : i32
    %c0_i32_0 = arith.constant 0 : i32
    return %c0_i32 : i32
  }
  func.func @transform_1(%arg0: i32) -> (i32, i32) {
    %c0_i32 = arith.constant 0 : i32
    %c0_i32_0 = arith.constant 0 : i32
    return %arg0, %c0_i32 : i32, i32
  }
  func.func @transform_2(%arg0: i32) -> (i32, i32) {
    %c0_i32 = arith.constant 0 : i32
    %c0_i32_0 = arith.constant 0 : i32
    %c0_i32_1 = arith.constant 0 : i32
    return %c0_i32, %c0_i32_0 : i32, i32
  }
  func.func @transform_3(%arg0: i32) -> (i32, i32) {
    %c0_i32 = arith.constant 0 : i32
    %c0_i32_0 = arith.constant 0 : i32
    return %arg0, %c0_i32 : i32, i32
  }
}

</mosaic_0001>

<bundles_post_ra>
// kernel: tpu_custom_call.1
= control target key start
LH: loop header
LB: loop body
LE: loop exit
PB: predicated region body
PF: predicated region fallthrough
CT: control target
= control target key end

     0   :  { %s2603_s0 = inlined_call_operand.<no memory space> [shape: f32[1], index: 0, kind: input, shape index: {}]   ;;  %s2604_s1 = inlined_call_operand.hbm [shape: f32[20,256], index: 1, kind: input, shape index: {}]   ;;  %s2605_s2 = inlined_call_operand.hbm [shape: f32[256,128], index: 2, kind: input, shape index: {}]   ;;  %s2606_s3 = inlined_call_operand.hbm [shape: f32[20,128], index: 3, kind: output, shape index: {}]  }
   0x1   :  { %8 = sst [smem:[#allocation2]] %s2603_s0 }
   0x2   :  { %9 = vsyncpa [#allocation4], 0 }
   0x3   :  { %11 = vsyncpa [#allocation4 + $0x1], 0 }
   0x4   :  { %12 = vsyncpa [#allocation7], 0 }
   0x5   :  { %13 = vsyncpa [#allocation5], 0 }
   0x6   :  { %15 = vsyncpa [#allocation5 + $0x1], 0  ;;  %s1771_s14 = smov 0   ;;  %s1773_s15 = smov 0  }
   0x7   :  { %s1775_s16 = smov 0   ;;  %s1777_s17 = smov 0  }
   0x8 LB: > { %s1792_s0 = sadd.s32 4294967295, %s1737_s17   ;;  %s1295_s18 = sadd.s32 4294967294, %s1737_s17   ;;  %s1737_s17 = sphi %s1777_s17, %s2794_s17   ;;  %s1733_s16 = sphi %s1775_s16, %s2793_s16   ;;  %s1729_s15 = sphi %s1773_s15, %s2792_s15   ;;  %s1725_s14 = sphi %s1771_s14, %s2791_s14  }
   0x9   : > { %s1796_s19 = sadd.s32 1, %s1737_s17   ;;  %s49_s20 = sadd.s32 1, %s1733_s16 }
   0xa   : > { %s46_s21 = ssub.s32 %s1737_s17, %s1796_s19  ;;  %p56_p0 = scmp.ne.s32.totalorder %s1733_s16, %s1729_s15 }
   0xb   : > { %p47_p1 = scmp.eq.s32.totalorder %s46_s21, 0  ;;  %p57_p2 = scmp.eq.s32.totalorder %s1737_s17, 0 }
   0xc   : > { %p62_p3 = scmp.ne.s32.totalorder %s1729_s15, %s1725_s14  ;;  %p63_p4 = scmp.eq.s32.totalorder %s1792_s0, 0 }
   0xd   : > { %s1808_s22 = scalar_select %p47_p1, %s1733_s16, %s49_s20  }
   0xe   : > { %p1810_p5 = por %p57_p2, %p56_p0  ;;  %p1816_p6 = por %p63_p4, %p62_p3 }
   0xf   : > { %p107_p7 = scmp.eq.s32.totalorder %s1792_s0, 1  ;;  %p113_p8 = scmp.eq.s32.totalorder %s1295_s18, 1 }
  0x10   : > { %s2682_s24 = scalar_select %p1816_p6, 1, 0 }
  0x11   : > { %p1296_p9 = scmp.ge.s32.totalorder %s1737_s17, 1  ;;  %p120_p10 = scmp.lt.s32.totalorder %s1737_s17, 3 }
  0x12   : > { %p1823_p11 = por %p107_p7, %p56_p0  ;;  %p1827_p12 = por %p113_p8, %p62_p3 }
  0x13   : > { %p1831_p13 = pnand %p1296_p9, %p120_p10  ;;  %s1739_s28 = smov [#allocation6]  }
  0x14   : > { %s2683_s25 = scalar_select %p1823_p11, 1, 0 }
  0x15   : > { %s2684_s26 = scalar_select %p1827_p12, 1, 0 }
  0x16   : > { %p1559_p1 = pneg %p1831_p13  ;;  %s135_s29 = sshll.u32 %s1739_s28, 4  ;;  %s136_s29 = int_to_ptr.vmem [resolvable:$true] %s135_s29 }
  0x17   : > { %s1628_s30 = scalar_lea.vmem %s136_s29, 4096  ;;  %p1636_p8 = scmp.lt.s32.totalorder %s136_s29, %s136_s29 }
  0x18   : > { %p1560_p2 = pnand %p1559_p1, %p63_p4  ;;  %p1629_p7 = scmp.ne.s32.totalorder %s136_s29, %s1628_s30 }
  0x19   : > { %p1637_p6 = scmp.lt.s32.totalorder %s1628_s30, %s1628_s30 }
  0x1a   : > { %p1619_p0 = pneg %p1560_p2 }
  0x1b   : > { %p1638_p12 = por %p1637_p6, %p1636_p8 }
  0x1c   : > { %p1631_p11 = pnand %p1629_p7, %p1619_p0 }
  0x1e   : > { %p1632_p3 = pneg %p1631_p11 }
  0x20   : > { %p1639_p9 = pnand %p1638_p12, %p1632_p3 }
  0x22   : > { %1642 = shalt.err (!%p1639_p9)
}
  0x23   : > { %s1740_s4 = smov 128   ;;  %s1741_s5 = smov 8  }
  0x24   : > { %1562 = dma.hbm_to_vmem [thread:$0]  (!%p1560_p2), %s2605_s2, 4096, %s136_s29, [#allocation7], %s1740_s4, %s1740_s4, %s1741_s5  }
  0x25   : > { %p2608_p10 = scmp.ge.s32.totalorder %s1737_s17, 2 }
  0x27   : > { %145 = sbr.rel (%p2608_p10) target bundleno = 76 (0x4c), region = 24 }
  0x2c   : > { %148 = sbr.rel (!%p1810_p5) target bundleno = 76 (0x4c), region = 28  ;;  %s149_s8 = sand.u32 (%p1810_p5), 1, %s1733_s16  }
  0x2d   : > { %s1300_s9 = sshll.u32 (%p1810_p5), %s1737_s17, 1  ;;  %s1299_s10 = sshll.u32 (%p1810_p5), %s149_s8, 5 }
  0x2e   : > { %s155_s11 = ssub.s32 (%p1810_p5), 3, %s1300_s9  ;;  %s1852_s18 = scalar_lea.sflag (%p1810_p5), [#allocation4], %s149_s8 }
  0x2f   : > { %p156_p6 = scmp.lt.s32.totalorder (%p1810_p5), %s155_s11, 2  ;;  %s153_s20 = scalar_lea.vmem (%p1810_p5), [#allocation3], %s1299_s10 }
  0x31   : > { %s2796_s11 = smov (!%p156_p6, %s155_s11), 2 }
  0x32   : > { %s1849_s12 = sshll.u32 %s2796_s11, 8 }
  0x33   : > { %s161_s13 = ssub.s32 512, %s1849_s12 }
  0x34   : > { %162 = vsyncadd %s1852_s18, %s161_s13  ;;  %p1303_p5 = scmp.ne.s32.totalorder %s1849_s12, 0  ;;  %s1323_s21 = sshll.u32 %s1737_s17, 9 }
  0x35   : > { %s1860_s29 = scalar_lea.hbm %s2604_s1, %s1323_s21  ;;  %s168_s30 = sshll.u32 %s153_s20, 4  ;;  %s1862_s30 = int_to_ptr.vmem [resolvable:$true] %s168_s30 }
  0x36   : > { %s1643_s4 = scalar_lea.hbm %s1860_s29, %s1849_s12  ;;  %s1647_s7 = scalar_lea.hbm %s2604_s1, 768 }
  0x37   : > { %p1644_p11 = scmp.ne.s32.totalorder %s1860_s29, %s1643_s4  ;;  %p1648_p2 = scmp.lt.s32.totalorder %s1860_s29, %s2604_s1 }
  0x38   : > { %p1649_p0 = scmp.lt.s32.totalorder %s1647_s7, %s1643_s4 }
  0x39   : > { %p1645_p12 = pnand %p1644_p11, %p1303_p5 }
  0x3a   : > { %p1650_p7 = por %p1649_p0, %p1648_p2 }
  0x3b   : > { %p1646_p1 = pneg %p1645_p12 }
  0x3d   : > { %p1651_p3 = pnand %p1650_p7, %p1646_p1 }
  0x3f   : > { %1654 = shalt.err (!%p1651_p3)
}
  0x40   : > { %s1655_s10 = scalar_lea.vmem %s1862_s30, %s1849_s12  ;;  %s1742_s11 = smov [#allocation3]  }
  0x41   : > { %p1656_p8 = scmp.ne.s32.totalorder %s1862_s30, %s1655_s10  ;;  %s1659_s13 = sshll.u32 %s1742_s11, 4  ;;  %s1660_s13 = int_to_ptr.vmem [resolvable:$false] %s1659_s13 }
  0x42   : > { %s1661_s20 = scalar_lea.vmem %s1660_s13, 1024  ;;  %p1662_p11 = scmp.lt.s32.totalorder %s1862_s30, %s1660_s13 }
  0x43   : > { %p1657_p9 = pnand %p1656_p8, %p1303_p5  ;;  %p1663_p12 = scmp.lt.s32.totalorder %s1661_s20, %s1655_s10 }
  0x45   : > { %p1658_p6 = pneg %p1657_p9  ;;  %p1664_p10 = por %p1663_p12, %p1662_p11 }
  0x47   : > { %p1665_p2 = pnand %p1664_p10, %p1658_p6 }
  0x49   : > { %1668 = shalt.err (!%p1665_p2)
}
  0x4a   : > { %s1743_s21 = smov 256   ;;  %s1744_s23 = smov 16  }
  0x4b   : > { %174 = dma.hbm_to_vmem [thread:$0]  (%p1303_p5), %s1860_s29, %s1849_s12, %s1862_s30, %s1852_s18, %s1743_s21, %s1743_s21, %s1744_s23  }
  0x4c PF: > { %180 = sbr.rel (%p1831_p13) target bundleno = 474 (0x1da), region = 32 }
  0x51   : > { %s1891_s28 = sand.u32 1, %s1729_s15   ;;  %p2686_p10 = scmp.ne.s32.totalorder %s2682_s24, 0 }
  0x52   : > { %s1309_s4 = sshll.u32 %s1891_s28, 5  ;;  %s183_s5 = scalar_lea.sflag [#allocation4], %s1891_s28 }
  0x53   : > { %s1895_s6 = scalar_lea.vmem [#allocation3], %s1309_s4 }
  0x54   : > { %1712 = dma.done.wait (%p2686_p10), %s183_s5, 512  }
  0x55   : > { %1714 = vsyncadd (%p2686_p10), %s183_s5, 4294966784 }
  0x56   : > { %1716 = dma.done.wait (%p63_p4), [#allocation7], 4096  }
  0x57   : > { %1718 = vsyncadd (%p63_p4), [#allocation7], 4294963200  ;;  %v259_v0 = vld [vmem:[#allocation6 + $0xf8] sm:$0xff]  ;;  %v258_v2 = vld [vmem:[#allocation6 + $0xf0] sm:$0xff]  ;;  %s260_s24 = sld [smem:[#allocation2]]  ;;  %s1311_s27 = sshll.u32 %s1891_s28, 4 }
  0x58   : > { %v243_v1 = vld [vmem:[#allocation6 + $0x78] sm:$0xff]  ;;  %v1905_v3 = vand.u32 4294901760, %v259_v0  ;;  %v1909_v5 = vand.u32 4294901760, %v258_v2  ;;  %v242_v6 = vld [vmem:[#allocation6 + $0x70] sm:$0xff]  ;;  %v257_v7 = vld [vmem:[#allocation6 + $0xe8] sm:$0xff]  ;;  %s212_s12 = scalar_lea.vmem [#allocation8], %s1311_s27 }
  0x59   : > { %v1907_v4 = vand.u32 4294901760, %v243_v1  ;;  %v241_v8 = vld [vmem:[#allocation6 + $0x68] sm:$0xff]  ;;  %v1911_v9 = vand.u32 4294901760, %v242_v6  ;;  %v1913_v10 = vand.u32 4294901760, %v257_v7  ;;  %v256_v12 = vld [vmem:[#allocation6 + $0xe0] sm:$0xff]  ;;  %v255_v14 = vld [vmem:[#allocation6 + $0xd8] sm:$0xff] }
  0x5a   : > { %v1915_v11 = vand.u32 4294901760, %v241_v8  ;;  %v240_v13 = vld [vmem:[#allocation6 + $0x60] sm:$0xff]  ;;  %1325 = vmatprep.subr.mxu0 %v1905_v3  ;;  %v1918_v15 = vand.u32 4294901760, %v256_v12  ;;  %v1922_v17 = vand.u32 4294901760, %v255_v14  ;;  %v1925_v18 = vsub.f32 %v259_v0, %v1905_v3  ;;  %v1927_v19 = vld [vmem:[#allocation6 + $0x58] sm:$0xff]  ;;  %v1929_v20 = vld [vmem:[#allocation6 + $0xd0] sm:$0xff] }
  0x5b   : > { %v1920_v16 = vand.u32 4294901760, %v240_v13  ;;  %v1931_v21 = vld [vmem:[#allocation6 + $0x50] sm:$0xff]  ;;  %1326 = vmatpush3.msra.mxu0 %v1907_v4  ;;  %v1935_v22 = vand.u32 4294901760, %v1927_v19  ;;  %v1938_v23 = vsub.f32 %v243_v1, %v1907_v4  ;;  %v1941_v24 = vand.u32 4294901760, %v1929_v20  ;;  %v1946_v26 = vld [vmem:[#allocation6 + $0xc8] sm:$0xff]  ;;  %v1950_v28 = vld [vmem:[#allocation6 + $0xc0] sm:$0xff] }
  0x5c   : > { %v1944_v25 = vsub.f32 %v258_v2, %v1909_v5  ;;  %v1948_v27 = vld [vmem:[#allocation6 + $0x48] sm:$0xff]  ;;  %1327 = vmatprep.subr.mxu0 %v1909_v5  ;;  %v2622_v29 = vand.u32 4294901760, %v1925_v18  ;;  %v1955_v30 = vand.u32 4294901760, %v1931_v21  ;;  %v1958_v31 = vsub.f32 %v242_v6, %v1911_v9  ;;  %v1972_v37 = vld [vmem:[#allocation6 + $0x40] sm:$0xff]  ;;  %v1996_v46 = vld [vmem:[#allocation6 + $0xb8] sm:$0xff]  ;;  %s1193_s18 = scalar_lea.sflag [#allocation5], %s1891_s28 }
  0x5d   : > { %2687 = vst [vmem:[#allocation12_spill] sm:$0xff] %v1941_v24  ;;  %v1961_v32 = vand.u32 4294901760, %v1946_v26  ;;  %1328 = vmatpush3.msra.mxu0 %v1911_v9  ;;  %v2620_v33 = vand.u32 4294901760, %v1938_v23  ;;  %v1967_v35 = vsub.f32 %v257_v7, %v1913_v10  ;;  %v1970_v36 = vand.u32 4294901760, %v1948_v27  ;;  %v2006_v51 = vld [vmem:[#allocation6 + $0x38] sm:$0xff]  ;;  %v2013_v56 = vld [vmem:[#allocation6 + $0xb0] sm:$0xff] }
  0x5e   : > { %2688 = vst [vmem:[#allocation13_spill] sm:$0xff] %v1955_v30  ;;  %v2619_v34 = vand.u32 4294901760, %v1944_v25  ;;  %1329 = vmatprep.subr.mxu0 %v1913_v10  ;;  %v505_v38 = vsub.f32 %v1925_v18, %v2622_v29  ;;  %v2617_v39 = vand.u32 4294901760, %v1958_v31  ;;  %v1980_v40 = vsub.f32 %v241_v8, %v1915_v11  ;;  %v2025_v61 = vld [vmem:[#allocation6 + $0x30] sm:$0xff]  ;;  %v2037_v2 = vld [vmem:[#allocation6 + $0xa8] sm:$0xff]  ;;  %p2788_p4 = scmp.ne.s32.totalorder %s2683_s25, 0 }
  0x5f   : > { %2689 = vst [vmem:[#allocation14_spill] sm:$0xff] %v1961_v32  ;;  %2690 = vst [vmem:[#allocation15_spill] sm:$0xff] %v1970_v36  ;;  %v1983_v41 = vand.u32 4294901760, %v1950_v28  ;;  %1330 = vmatpush3.msra.mxu0 %v1915_v11  ;;  %v393_v42 = vsub.f32 %v1938_v23, %v2620_v33  ;;  %v2615_v44 = vand.u32 4294901760, %v1967_v35  ;;  %v1994_v45 = vsub.f32 %v256_v12, %v1918_v15  ;;  %s1313_s29 = sshll.u32 (%p2788_p4), %s1792_s0, 1 }
  0x60   : > { %v512_v43 = vsub.f32 %v1944_v25, %v2619_v34  ;;  %1331 = vmatprep.subr.mxu0 %v1918_v15  ;;  %v506_v47 = vand.u32 4294901760, %v505_v38  ;;  %v400_v48 = vsub.f32 %v1958_v31, %v2617_v39  ;;  %v2614_v49 = vand.u32 4294901760, %v1980_v40  ;;  %v2128_v39 = vld [vmem:[#allocation6 + $0x90] sm:$0xff]  ;;  %s1201_s30 = ssub.s32 (%p2788_p4), 3, %s1313_s29 }
  0x61   : > { %2691 = vst [vmem:[#allocation16_spill] sm:$0xff] %v1983_v41  ;;  %v2004_v50 = vand.u32 4294901760, %v1972_v37  ;;  %1332 = vmatpush3.msra.mxu0 %v1920_v16  ;;  %v394_v52 = vand.u32 4294901760, %v393_v42  ;;  %v519_v54 = vsub.f32 %v1967_v35, %v2615_v44  ;;  %v2612_v55 = vand.u32 4294901760, %v1994_v45  ;;  %v2138_v34 = vld [vmem:[#allocation6 + $0x10] sm:$0xff]  ;;  %p1202_p13 = scmp.lt.s32.totalorder (%p2788_p4), %s1201_s30, 2 }
  0x62   : > { %v513_v53 = vand.u32 4294901760, %v512_v43  ;;  %1333 = vmatprep.subr.mxu0 %v1922_v17  ;;  %1363 = vmatprep.subr.mxu1 %v506_v47  ;;  %v401_v57 = vand.u32 4294901760, %v400_v48  ;;  %v407_v58 = vsub.f32 %v1980_v40, %v2614_v49  ;;  %v2020_v59 = vsub.f32 %v240_v13, %v1920_v16  ;;  %v2048_v13 = vld [vmem:[#allocation6 + $0x28] sm:$0xff]  ;;  %v2115_v49 = vld [vmem:[#allocation6 + $0x18] sm:$0xff] }
  0x63   : > { %2692 = vst [vmem:[#allocation17_spill] sm:$0xff] %v2004_v50  ;;  %v2023_v60 = vand.u32 4294901760, %v1996_v46  ;;  %1334 = vmatpush3.msra.mxu0 %v1935_v22  ;;  %1364 = vmatpush3.msra.mxu1 %v394_v52  ;;  %v520_v62 = vand.u32 4294901760, %v519_v54  ;;  %v526_v63 = vsub.f32 %v1994_v45, %v2612_v55  ;;  %v2032_v0 = vsub.f32 %v255_v14, %v1922_v17 }
  0x64   : > { %v2035_v1 = vand.u32 4294901760, %v2006_v51  ;;  %1335 = vmatprep.subr.mxu0 %v1941_v24  ;;  %1365 = vmatprep.subr.mxu1 %v513_v53  ;;  %v408_v6 = vand.u32 4294901760, %v407_v58  ;;  %v2610_v7 = vand.u32 4294901760, %v2020_v59  ;;  %v2043_v8 = vsub.f32 %v1927_v19, %v1935_v22 }
  0x65   : > { %2693 = vst [vmem:[#allocation18_spill] sm:$0xff] %v2023_v60  ;;  %v2046_v12 = vand.u32 4294901760, %v2013_v56  ;;  %1336 = vmatpush3.msra.mxu0 %v1955_v30  ;;  %1366 = vmatpush3.msra.mxu1 %v401_v57  ;;  %v527_v14 = vand.u32 4294901760, %v526_v63  ;;  %v2609_v38 = vand.u32 4294901760, %v2032_v0  ;;  %v2054_v42 = vsub.f32 %v1929_v20, %v1941_v24  ;;  %v2071_v20 = vld [vmem:[#allocation6 + $0xa0] sm:$0xff] }
  0x66   : > { %2694 = vst [vmem:[#allocation19_spill] sm:$0xff] %v2035_v1  ;;  %v2057_v43 = vand.u32 4294901760, %v2025_v61  ;;  %1337 = vmatprep.subr.mxu0 %v1961_v32  ;;  %1367 = vmatprep.subr.mxu1 %v520_v62  ;;  %v414_v19 = vsub.f32 %v2020_v59, %v2610_v7  ;;  %v2611_v47 = vand.u32 4294901760, %v2043_v8  ;;  %v2066_v48 = vsub.f32 %v1931_v21, %v1955_v30 }
  0x67   : > { %2695 = vst [vmem:[#allocation20_spill] sm:$0xff] %v2046_v12  ;;  %v2069_v52 = vand.u32 4294901760, %v2037_v2  ;;  %1338 = vmatpush3.msra.mxu0 %v1970_v36  ;;  %1368 = vmatpush3.msra.mxu1 %v408_v6  ;;  %v533_v53 = vsub.f32 %v2032_v0, %v2609_v38  ;;  %v2613_v54 = vand.u32 4294901760, %v2054_v42  ;;  %v2080_v57 = vsub.f32 %v1946_v26, %v1961_v32  ;;  %v2094_v38 = vld [vmem:[#allocation6 + $0x20] sm:$0xff] }
  0x68   : > { %2696 = vst [vmem:[#allocation21_spill] sm:$0xff] %v2057_v43  ;;  %v2083_v21 = vand.u32 4294901760, %v2048_v13  ;;  %1339 = vmatprep.subr.mxu0 %v1983_v41  ;;  %1369 = vmatprep.subr.mxu1 %v527_v14  ;;  %v415_v58 = vand.u32 4294901760, %v414_v19  ;;  %v421_v62 = vsub.f32 %v2043_v8, %v2611_v47  ;;  %v2616_v63 = vand.u32 4294901760, %v2066_v48  ;;  %v2104_v47 = vld [vmem:[#allocation6 + $0x98] sm:$0xff] }
  0x69   : > { %2697 = vst [vmem:[#allocation22_spill] sm:$0xff] %v2069_v52  ;;  %v2092_v6 = vsub.f32 %v1948_v27, %v1970_v36  ;;  %1340 = vmatpush3.msra.mxu0 %v2004_v50  ;;  %v534_v26 = vand.u32 4294901760, %v533_v53  ;;  %v540_v14 = vsub.f32 %v2054_v42, %v2613_v54  ;;  %v2618_v19 = vand.u32 4294901760, %v2080_v57  ;;  %v225_v36 = vld [vmem:[%s1895_s6 + $0x8] sm:$0xff] }
  0x6a   : > { %2698 = vst [vmem:[#allocation23_spill] sm:$0xff] %v2083_v21  ;;  %v2102_v7 = vand.u32 4294901760, %v2071_v20  ;;  %1370 = vmatpush3.msra.mxu1 %v415_v58  ;;  %1341 = vmatprep.subr.mxu0 %v2023_v60  ;;  %v422_v27 = vand.u32 4294901760, %v421_v62  ;;  %v428_v55 = vsub.f32 %v2066_v48, %v2616_v63  ;;  %v2113_v54 = vsub.f32 %v1950_v28, %v1983_v41 }
  0x6b   : > { %v2621_v53 = vand.u32 4294901760, %v2092_v6  ;;  %1371 = vmatprep.subr.mxu1 %v534_v26  ;;  %1342 = vmatpush3.msra.mxu0 %v2035_v1  ;;  %v541_v44 = vand.u32 4294901760, %v540_v14  ;;  %v547_v58 = vsub.f32 %v2080_v57, %v2618_v19  ;;  %v2122_v62 = vand.u32 4294901760, %v2094_v38 }
  0x6c   : > { %2699 = vst [vmem:[#allocation24_spill] sm:$0xff] %v2102_v7  ;;  %v2126_v63 = vsub.f32 %v1972_v37, %v2004_v50  ;;  %1372 = vmatpush3.msra.mxu1 %v422_v27  ;;  %1343 = vmatprep.subr.mxu0 %v2046_v12  ;;  %v429_v28 = vand.u32 4294901760, %v428_v55  ;;  %v2625_v14 = vand.u32 4294901760, %v2113_v54  ;;  %v2136_v19 = vand.u32 4294901760, %v2104_v47 }
  0x6d   : > { %2700 = vst [vmem:[#allocation25_spill] sm:$0xff] %v2122_v62  ;;  %v435_v26 = vsub.f32 %v2092_v6, %v2621_v53  ;;  %1373 = vmatprep.subr.mxu1 %v541_v44  ;;  %1344 = vmatpush3.msra.mxu0 %v2057_v43  ;;  %v548_v37 = vand.u32 4294901760, %v547_v58  ;;  %v2144_v55 = vsub.f32 %v1996_v46, %v2023_v60  ;;  %v2147_v33 = vand.u32 4294901760, %v2115_v49  ;;  %v2149_v53 = vld [vmem:[#allocation6 + $0x88] sm:$0xff] }
  0x6e   : > { %2701 = vst [vmem:[#allocation26_spill] sm:$0xff] %v2136_v19  ;;  %v2628_v27 = vand.u32 4294901760, %v2126_v63  ;;  %1374 = vmatpush3.msra.mxu1 %v429_v28  ;;  %1345 = vmatprep.subr.mxu0 %v2069_v52  ;;  %v554_v44 = vsub.f32 %v2113_v54, %v2625_v14  ;;  %v2157_v58 = vsub.f32 %v2006_v51, %v2035_v1  ;;  %v2160_v46 = vand.u32 4294901760, %v2128_v39  ;;  %v2174_v51 = vld [vmem:[#allocation6 + $0x8] sm:$0xff] }
  0x6f   : > { %2702 = vst [vmem:[#allocation27_spill] sm:$0xff] %v2147_v33  ;;  %v436_v29 = vand.u32 4294901760, %v435_v26  ;;  %1375 = vmatprep.subr.mxu1 %v548_v37  ;;  %1346 = vmatpush3.msra.mxu0 %v2083_v21  ;;  %v2169_v60 = vsub.f32 %v2013_v56, %v2046_v12  ;;  %v2172_v14 = vand.u32 4294901760, %v2138_v34  ;;  %v2183_v26 = vand.u32 4294901760, %v2149_v53  ;;  %v2185_v56 = vld [vmem:[#allocation6 + $0x80] sm:$0xff] }
  0x70   : > { %2703 = vst [vmem:[#allocation28_spill] sm:$0xff] %v2160_v46  ;;  %v442_v28 = vsub.f32 %v2126_v63, %v2628_v27  ;;  %1347 = vmatprep.subr.mxu0 %v2102_v7  ;;  %v555_v37 = vand.u32 4294901760, %v554_v44  ;;  %v2180_v27 = vsub.f32 %v2025_v61, %v2057_v43  ;;  %v2706_v50 = vand.u32 4294901760, %v2144_v55  ;;  %v2208_v44 = vld [vmem:[#allocation6] sm:$0xff] }
  0x71   : > { %2704 = vst [vmem:[#allocation29_spill] sm:$0xff] %v2172_v14  ;;  %1376 = vmatpush3.msra.mxu1 %v436_v29  ;;  %2705 = vst [vmem:[#allocation30_spill] sm:$0xff] %v2183_v26  ;;  %1348 = vmatpush3.msra.mxu0 %v2122_v62  ;;  %v2194_v1 = vsub.f32 %v2037_v2, %v2069_v52  ;;  %v2708_v61 = vand.u32 4294901760, %v2157_v58  ;;  %v2202_v41 = vand.u32 4294901760, %v2174_v51  ;;  %v2216_v52 = vand.u32 4294901760, %v2185_v56 }
  0x72   : > { %v443_v12 = vand.u32 4294901760, %v442_v28  ;;  %v561_v29 = vsub.f32 %v2144_v55, %v2706_v50  ;;  %1377 = vmatprep.subr.mxu1 %v555_v37  ;;  %1349 = vmatprep.subr.mxu0 %v2136_v19  ;;  %v2206_v50 = vsub.f32 %v2048_v13, %v2083_v21  ;;  %v2710_v37 = vand.u32 4294901760, %v2169_v60 }
  0x73   : > { %2707 = vst [vmem:[#allocation31_spill] sm:$0xff] %v2194_v1  ;;  %v449_v43 = vsub.f32 %v2157_v58, %v2708_v61  ;;  %1350 = vmatpush3.msra.mxu0 %v2147_v33  ;;  %v2711_v13 = vand.u32 4294901760, %v2180_v27  ;;  %v2226_v21 = vsub.f32 %v2071_v20, %v2102_v7  ;;  %v2712_v30 = vand.u32 4294901760, %v2194_v1 }
  0x74   : > { %2709 = vst [vmem:[#allocation32_spill] sm:$0xff] %v2206_v50  ;;  %1378 = vmatpush3.msra.mxu1 %v443_v12  ;;  %v562_v2 = vand.u32 4294901760, %v561_v29  ;;  %v568_v61 = vsub.f32 %v2169_v60, %v2710_v37  ;;  %1351 = vmatprep.subr.mxu0 %v2160_v46  ;;  %v224_v37 = vld [vmem:[%s1895_s6] sm:$0xff]  ;;  %v2234_v24 = vand.u32 4294901760, %v2208_v44  ;;  %v2714_v20 = vand.u32 4294901760, %v2206_v50 }
  0x75   : > { %v450_v32 = vand.u32 4294901760, %v449_v43  ;;  %v456_v12 = vsub.f32 %v2180_v27, %v2711_v13  ;;  %1352 = vmatpush3.msra.mxu0 %v2172_v14  ;;  %v575_v43 = vsub.f32 %v2194_v1, %v2712_v30  ;;  %v2238_v13 = vsub.f32 %v2094_v38, %v2122_v62 }
  0x76   : > { %1379 = vmatprep.subr.mxu1 %v562_v2  ;;  %v569_v28 = vand.u32 4294901760, %v568_v61  ;;  %1353 = vmatprep.subr.mxu0 %v2183_v26  ;;  %v463_v2 = vsub.f32 %v2206_v50, %v2714_v20  ;;  %v2653_v61 = vand.u32 4294901760, %v2226_v21  ;;  %v2245_v7 = vand.u32 4294901760, %v225_v36 }
  0x77   : > { %2713 = vst [vmem:[#allocation33_spill] sm:$0xff] %v2238_v13  ;;  %1380 = vmatpush3.msra.mxu1 %v450_v32  ;;  %v457_v29 = vand.u32 4294901760, %v456_v12  ;;  %v576_v30 = vand.u32 4294901760, %v575_v43  ;;  %1354 = vmatpush3.msra.mxu0 %v2202_v41  ;;  %v2654_v1 = vand.u32 4294901760, %v2238_v13  ;;  %v2251_v32 = vsub.f32 %v2104_v47, %v2136_v19 }
  0x78   : > { %2715 = vst [vmem:[#allocation34_spill] sm:$0xff] %v2245_v7  ;;  %1381 = vmatprep.subr.mxu1 %v569_v28  ;;  %v2253_v38 = vand.u32 4294901760, %v224_v37  ;;  %v464_v12 = vand.u32 4294901760, %v463_v2  ;;  %1355 = vmatprep.subr.mxu0 %v2216_v52  ;;  %v582_v20 = vsub.f32 %v2226_v21, %v2653_v61  ;;  %v2260_v28 = vsub.f32 %v225_v36, %v2245_v7 }
  0x79   : > { %1382 = vmatpush3.msra.mxu1 %v457_v29  ;;  %v2264_v43 = vsub.f32 %v2115_v49, %v2147_v33  ;;  %1356 = vmatpush3.msra.mxu0 %v2234_v24  ;;  %v470_v47 = vsub.f32 %v2238_v13, %v2654_v1  ;;  %v2276_v36 = vsub.f32 %v2128_v39, %v2160_v46 }
  0x7a   : > { %2716 = vst [vmem:[#allocation35_spill] sm:$0xff] %v2253_v38  ;;  %1383 = vmatprep.subr.mxu1 %v576_v30  ;;  %v2272_v2 = vsub.f32 %v224_v37, %v2253_v38  ;;  %v583_v61 = vand.u32 4294901760, %v582_v20  ;;  %v2659_v49 = vand.u32 4294901760, %v2260_v28  ;;  %1401 = vmatprep.subr.mxu0 %v1925_v18  ;;  %v2283_v1 = vsub.f32 %v2138_v34, %v2172_v14 }
  0x7b   : > { %2717 = vst [vmem:[#allocation36_spill] sm:$0xff] %v2264_v43  ;;  %1384 = vmatpush3.msra.mxu1 %v464_v12  ;;  %v2662_v30 = vand.u32 4294901760, %v2264_v43  ;;  %v471_v29 = vand.u32 4294901760, %v470_v47  ;;  %v2718_v37 = vand.u32 4294901760, %v2251_v32  ;;  %614 = vmatprep.mubr.f32.mxu1 %v2245_v7  ;;  %v2720_v7 = vand.u32 4294901760, %v2276_v36 }
  0x7c   : > { %1385 = vmatprep.subr.mxu1 %v583_v61  ;;  %v361_v20 = vsub.f32 %v2260_v28, %v2659_v49  ;;  %v2719_v12 = vand.u32 4294901760, %v2272_v2  ;;  %v2310_v14 = vsub.f32 %v2174_v51, %v2202_v41  ;;  %v2721_v46 = vand.u32 4294901760, %v2283_v1 }
  0x7d   : > { %v589_v33 = vsub.f32 %v2251_v32, %v2718_v37  ;;  %v477_v34 = vsub.f32 %v2264_v43, %v2662_v30  ;;  %v2300_v37 = vsub.f32 %v2149_v53, %v2183_v26  ;;  %1386 = vmatpush3.msra.mxu1 %v471_v29  ;;  %v596_v49 = vsub.f32 %v2276_v36, %v2720_v7 }
  0x7e   : > { %v367_v61 = vsub.f32 %v2272_v2, %v2719_v12  ;;  %v362_v30 = vand.u32 4294901760, %v361_v20  ;;  %v484_v53 = vsub.f32 %v2283_v1, %v2721_v46  ;;  %v2669_v12 = vand.u32 4294901760, %v2310_v14 }
  0x7f   : > { %v590_v39 = vand.u32 4294901760, %v589_v33  ;;  %v478_v47 = vand.u32 4294901760, %v477_v34  ;;  %v2670_v33 = vand.u32 4294901760, %v2300_v37  ;;  %v597_v26 = vand.u32 4294901760, %v596_v49 }
  0x80   : > { %v368_v29 = vand.u32 4294901760, %v367_v61  ;;  %v2319_v7 = vsub.f32 %v2185_v56, %v2216_v52  ;;  %363 = vmatprep.mubr.f32.mxu0 %v362_v30  ;;  %v485_v51 = vand.u32 4294901760, %v484_v53  ;;  %v2326_v46 = vsub.f32 %v2208_v44, %v2234_v24  ;;  %v227_v61 = vld [vmem:[%s1895_s6 + $0x18] sm:$0xff] }
  0x81   : > { %1387 = vmatprep.subr.mxu1 %v590_v39  ;;  %v603_v20 = vsub.f32 %v2300_v37, %v2670_v33  ;;  %v491_v49 = vsub.f32 %v2310_v14, %v2669_v12  ;;  %v2728_v12 = vld [vmem:[#allocation16_spill] sm:$0xff] }
  0x82   : > { %1388 = vmatpush3.msra.mxu1 %v478_v47  ;;  %2722 = vst [vmem:[#allocation37_spill] sm:$0xff] %v2326_v46  ;;  %369 = vmatmul.mubr.f32.vlgmr.msra.gmra.mxu0 %v368_v29  ;;  %v2668_v56 = vand.u32 4294901760, %v2319_v7  ;;  %v2667_v39 = vand.u32 4294901760, %v2326_v46  ;;  %v226_v29 = vld [vmem:[%s1895_s6 + $0x10] sm:$0xff] }
  0x83   : > { %1389 = vmatprep.subr.mxu1 %v597_v26  ;;  %1402 = vmatpush3.msra.mxu0 %v1938_v23  ;;  %v604_v30 = vand.u32 4294901760, %v603_v20  ;;  %v492_v44 = vand.u32 4294901760, %v491_v49  ;;  %v2354_v20 = vand.u32 4294901760, %v226_v29 }
  0x84   : > { %1390 = vmatpush3.msra.mxu1 %v485_v51  ;;  %1403 = vmatprep.subr.mxu0 %v1944_v25  ;;  %v610_v26 = vsub.f32 %v2319_v7, %v2668_v56  ;;  %v498_v34 = vsub.f32 %v2326_v46, %v2667_v39  ;;  %v2348_v51 = vand.u32 4294901760, %v227_v61  ;;  %v2727_v56 = vld [vmem:[#allocation15_spill] sm:$0xff] }
  0x85   : > { %1404 = vmatpush3.msra.mxu0 %v1958_v31  ;;  %1391 = vmatprep.subr.mxu1 %v604_v30  ;;  %v2368_v30 = vsub.f32 %v226_v29, %v2354_v20  ;;  %v2726_v29 = vld [vmem:[#allocation14_spill] sm:$0xff] }
  0x86   : > { %1405 = vmatprep.subr.mxu0 %v1967_v35  ;;  %1392 = vmatpush3.msra.mxu1 %v492_v44  ;;  %v611_v47 = vand.u32 4294901760, %v610_v26  ;;  %v499_v53 = vand.u32 4294901760, %v498_v34  ;;  %v2361_v49 = vsub.f32 %v227_v61, %v2348_v51  ;;  %v2723_v34 = vld [vmem:[#allocation12_spill] sm:$0xff]  ;;  %v2724_v61 = vld [vmem:[#allocation13_spill] sm:$0xff] }
  0x87   : > { %1406 = vmatpush3.msra.mxu0 %v1980_v40  ;;  %v2675_v26 = vand.u32 4294901760, %v2368_v30 }
  0x88   : > { %1393 = vmatprep.subr.mxu1 %v611_v47  ;;  %1407 = vmatprep.subr.mxu0 %v1994_v45  ;;  %v2671_v44 = vand.u32 4294901760, %v2361_v49 }
  0x89   : > { %1394 = vmatpush3.msra.mxu1 %v499_v53  ;;  %1408 = vmatpush3.msra.mxu0 %v2020_v59  ;;  %v2725_v53 = vld [vmem:[#allocation31_spill] sm:$0xff]  ;;  %v382_v39 = vsub.f32 %v2368_v30, %v2675_v26  ;;  %v2732_v26 = vld [vmem:[#allocation20_spill] sm:$0xff] }
  0x8a   : > { %616 = vmatmul.mubr.f32.vlgmr.msra.gmra.mxu1 %v2253_v38  ;;  %1409 = vmatprep.subr.mxu0 %v2032_v0  ;;  %v376_v47 = vsub.f32 %v2361_v49, %v2671_v44  ;;  %v2729_v44 = vld [vmem:[#allocation17_spill] sm:$0xff]  ;;  %v2730_v38 = vld [vmem:[#allocation18_spill] sm:$0xff] }
  0x8b   : > { %1439 = vmatprep.subr.mxu1 %v1905_v3  ;;  %1410 = vmatpush3.msra.mxu0 %v2043_v8 }
  0x8c   : > { %1440 = vmatpush3.msra.mxu1 %v1907_v4  ;;  %1411 = vmatprep.subr.mxu0 %v2054_v42  ;;  %v377_v33 = vand.u32 4294901760, %v376_v47  ;;  %v2734_v47 = vld [vmem:[#allocation22_spill] sm:$0xff] }
  0x8d   : > { %1441 = vmatprep.subr.mxu1 %v1909_v5  ;;  %1412 = vmatpush3.msra.mxu0 %v2066_v48 }
  0x8e   : > { %1442 = vmatpush3.msra.mxu1 %v1911_v9  ;;  %1413 = vmatprep.subr.mxu0 %v2080_v57 }
  0x8f   : > { %1443 = vmatprep.subr.mxu1 %v1913_v10  ;;  %1414 = vmatpush3.msra.mxu0 %v2092_v6 }
  0x90   : > { %1444 = vmatpush3.msra.mxu1 %v1915_v11  ;;  %1415 = vmatprep.subr.mxu0 %v2113_v54 }
  0x91   : > { %1445 = vmatprep.subr.mxu1 %v1918_v15  ;;  %1416 = vmatpush3.msra.mxu0 %v2126_v63 }
  0x92   : > { %1446 = vmatpush3.msra.mxu1 %v1920_v16  ;;  %1417 = vmatprep.subr.mxu0 %v2144_v55 }
  0x93   : > { %1447 = vmatprep.subr.mxu1 %v1922_v17  ;;  %1418 = vmatpush3.msra.mxu0 %v2157_v58 }
  0x94   : > { %1448 = vmatpush3.msra.mxu1 %v1935_v22  ;;  %1419 = vmatprep.subr.mxu0 %v2169_v60 }
  0x95   : > { %1449 = vmatprep.subr.mxu1 %v2723_v34  ;;  %1420 = vmatpush3.msra.mxu0 %v2180_v27 }
  0x96   : > { %1450 = vmatpush3.msra.mxu1 %v2724_v61  ;;  %1421 = vmatprep.subr.mxu0 %v2725_v53 }
  0x97   : > { %1451 = vmatprep.subr.mxu1 %v2726_v29  ;;  %1422 = vmatpush3.msra.mxu0 %v2206_v50  ;;  %v383_v50 = vand.u32 4294901760, %v382_v39  ;;  %v2731_v29 = vld [vmem:[#allocation19_spill] sm:$0xff]  ;;  %v2736_v39 = vld [vmem:[#allocation24_spill] sm:$0xff] }
  0x98   : > { %1452 = vmatpush3.msra.mxu1 %v2727_v56  ;;  %1423 = vmatprep.subr.mxu0 %v2226_v21 }
  0x99   : > { %1453 = vmatprep.subr.mxu1 %v2728_v12  ;;  %1424 = vmatpush3.msra.mxu0 %v2238_v13  ;;  %v2733_v13 = vld [vmem:[#allocation21_spill] sm:$0xff] }
  0x9a   : > { %1454 = vmatpush3.msra.mxu1 %v2729_v44  ;;  %1425 = vmatprep.subr.mxu0 %v2251_v32 }
  0x9b   : > { %1455 = vmatprep.subr.mxu1 %v2730_v38  ;;  %1426 = vmatpush3.msra.mxu0 %v2264_v43  ;;  %v2735_v43 = vld [vmem:[#allocation23_spill] sm:$0xff] }
  0x9c   : > { %1456 = vmatpush3.msra.mxu1 %v2731_v29  ;;  %1427 = vmatprep.subr.mxu0 %v2276_v36 }
  0x9d   : > { %1457 = vmatprep.subr.mxu1 %v2732_v26  ;;  %378 = vmatprep.mubr.f32.mxu0 %v377_v33  ;;  %v2738_v33 = vld [vmem:[#allocation27_spill] sm:$0xff] }
  0x9e   : > { %1428 = vmatpush3.msra.mxu0 %v2283_v1  ;;  %1458 = vmatpush3.msra.mxu1 %v2733_v13 }
  0x9f   : > { %384 = vmatmul.mubr.f32.gmra.mxu0 %v383_v50  ;;  %1429 = vmatprep.subr.mxu0 %v2300_v37  ;;  %v2737_v50 = vand.u32 4294901760, %v1925_v18  ;;  %v2744_v18 = vld [vmem:[#allocation30_spill] sm:$0xff] }
  0xa0   : > { %1459 = vmatprep.subr.mxu1 %v2734_v47  ;;  %1430 = vmatpush3.msra.mxu0 %v2310_v14 }
  0xa1   : > { %1460 = vmatpush3.msra.mxu1 %v2735_v43  ;;  %1431 = vmatprep.subr.mxu0 %v2319_v7  ;;  %v2739_v43 = vand.u32 4294901760, %v1938_v23  ;;  %v2745_v23 = vand.u32 4294901760, %v1967_v35  ;;  %v2749_v35 = vand.u32 4294901760, %v2020_v59  ;;  %v2754_v59 = vand.u32 4294901760, %v2361_v49 }
  0xa2   : > { %1461 = vmatprep.subr.mxu1 %v2736_v39  ;;  %1432 = vmatpush3.msra.mxu0 %v2326_v46  ;;  %v2740_v39 = vld [vmem:[#allocation28_spill] sm:$0xff]  ;;  %v2741_v46 = vand.u32 4294901760, %v1944_v25  ;;  %v2746_v25 = vand.u32 4294901760, %v1980_v40  ;;  %v2752_v40 = vand.u32 4294901760, %v2043_v8  ;;  %v2761_v8 = vand.u32 4294901760, %v2144_v55 }
  0xa3   : > { %758 = vmatprep.mubr.f32.mxu0 %v2260_v28  ;;  %1462 = vmatpush3.msra.mxu1 %v2122_v62  ;;  %v2742_v62 = vand.u32 4294901760, %v1958_v31  ;;  %v2747_v31 = vand.u32 4294901760, %v1994_v45  ;;  %v2753_v45 = vand.u32 4294901760, %v2054_v42  ;;  %v2766_v42 = vld [vmem:[#allocation14_spill] sm:$0xff]  ;;  %v2777_v55 = vand.u32 4294901760, %v2300_v37  ;;  %v2786_v37 = vld [vmem:[#allocation35_spill] sm:$0xff] }
  0xa4   : > { %761 = vmatmul.mubr.f32.vlgmr.msra.gmra.mxu0 %v2272_v2  ;;  %1463 = vmatprep.subr.mxu1 %v2136_v19  ;;  %v2743_v19 = vld [vmem:[#allocation29_spill] sm:$0xff] }
  0xa5   : > { %1477 = vmatprep.subr.mxu0 %v2737_v50  ;;  %1464 = vmatpush3.msra.mxu1 %v2738_v33 }
  0xa6   : > { %1478 = vmatpush3.msra.mxu0 %v2739_v43  ;;  %621 = vmatprep.mubr.f32.mxu1 %v2348_v51  ;;  %v2750_v43 = vand.u32 4294901760, %v2272_v2  ;;  %v2781_v2 = vld [vmem:[#allocation24_spill] sm:$0xff] }
  0xa7   : > { %1465 = vmatprep.subr.mxu1 %v2740_v39  ;;  %1479 = vmatprep.subr.mxu0 %v2741_v46  ;;  %v2751_v46 = vand.u32 4294901760, %v2032_v0  ;;  %v2757_v0 = vand.u32 4294901760, %v2080_v57  ;;  %v2772_v57 = vand.u32 4294901760, %v2251_v32  ;;  %v2779_v32 = vld [vmem:[#allocation23_spill] sm:$0xff] }
  0xa8   : > { %623 = vmatmul.mubr.f32.gmra.mxu1 %v2354_v20  ;;  %1480 = vmatpush3.msra.mxu0 %v2742_v62  ;;  %v2748_v62 = vand.u32 4294901760, %v2260_v28  ;;  %v2755_v28 = vand.u32 4294901760, %v2066_v48 }
  0xa9   : > { %1466 = vmatpush3.msra.mxu1 %v2743_v19  ;;  %767 = vmatprep.mubr.f32.mxu0 %v2361_v49 }
  0xaa   : > { %1467 = vmatprep.subr.mxu1 %v2744_v18  ;;  %1481 = vmatprep.subr.mxu0 %v2745_v23 }
  0xab   : > { %770 = vmatmul.mubr.f32.gmra.mxu0 %v2368_v30  ;;  %1468 = vmatpush3.msra.mxu1 %v2202_v41 }
  0xac   : > { %1482 = vmatpush3.msra.mxu0 %v2746_v25  ;;  %1469 = vmatprep.subr.mxu1 %v2216_v52 }
  0xad   : > { %1483 = vmatprep.subr.mxu0 %v2747_v31  ;;  %1470 = vmatpush3.msra.mxu1 %v2234_v24 }
  0xae   : > { %874 = vmatprep.mubr.f32.mxu1 %v2748_v62  ;;  %1484 = vmatpush3.msra.mxu0 %v2749_v35 }
  0xaf   : > { %878 = vmatmul.mubr.f32.vlgmr.msra.gmra.mxu1 %v2750_v43  ;;  %1485 = vmatprep.subr.mxu0 %v2751_v46 }
  0xb0   : > { %1515 = vmatprep.subr.mxu1 %v1905_v3  ;;  %1486 = vmatpush3.msra.mxu0 %v2752_v40  ;;  %v2756_v3 = vand.u32 4294901760, %v2368_v30 }
  0xb1   : > { %1516 = vmatpush3.msra.mxu1 %v1907_v4  ;;  %1487 = vmatprep.subr.mxu0 %v2753_v45  ;;  %v2758_v4 = vand.u32 4294901760, %v2092_v6 }
  0xb2   : > { %1517 = vmatprep.subr.mxu1 %v1909_v5  ;;  %885 = vmatprep.mubr.f32.mxu1 %v2754_v59  ;;  %v2759_v5 = vand.u32 4294901760, %v2113_v54 }
  0xb3   : > { %1488 = vmatpush3.msra.mxu0 %v2755_v28  ;;  %1518 = vmatpush3.msra.mxu1 %v1911_v9  ;;  %v2760_v9 = vand.u32 4294901760, %v2126_v63  ;;  %v2773_v63 = vld [vmem:[#allocation36_spill] sm:$0xff] }
  0xb4   : > { %889 = vmatmul.mubr.f32.gmra.mxu1 %v2756_v3  ;;  %1489 = vmatprep.subr.mxu0 %v2757_v0  ;;  %v2774_v6 = vand.u32 4294901760, %v2773_v63 }
  0xb5   : > { %1519 = vmatprep.subr.mxu1 %v1913_v10  ;;  %1490 = vmatpush3.msra.mxu0 %v2758_v4  ;;  %v2762_v10 = vand.u32 4294901760, %v2157_v58  ;;  %v2778_v58 = vand.u32 4294901760, %v2310_v14 }
  0xb6   : > { %1520 = vmatpush3.msra.mxu1 %v1915_v11  ;;  %1491 = vmatprep.subr.mxu0 %v2759_v5  ;;  %v2763_v11 = vand.u32 4294901760, %v2169_v60  ;;  %v2770_v60 = vld [vmem:[#allocation33_spill] sm:$0xff] }
  0xb7   : > { %1521 = vmatprep.subr.mxu1 %v1918_v15  ;;  %1492 = vmatpush3.msra.mxu0 %v2760_v9  ;;  %v2764_v15 = vand.u32 4294901760, %v2180_v27  ;;  %v2771_v54 = vand.u32 4294901760, %v2770_v60  ;;  %v2776_v27 = vand.u32 4294901760, %v2283_v1 }
  0xb8   : > { %1522 = vmatpush3.msra.mxu1 %v1920_v16  ;;  %1493 = vmatprep.subr.mxu0 %v2761_v8  ;;  %v2765_v16 = vand.u32 4294901760, %v2725_v53 }
  0xb9   : > { %1523 = vmatprep.subr.mxu1 %v1922_v17  ;;  %1494 = vmatpush3.msra.mxu0 %v2762_v10  ;;  %v2767_v17 = vld [vmem:[#allocation32_spill] sm:$0xff] }
  0xba   : > { %1524 = vmatpush3.msra.mxu1 %v1935_v22  ;;  %1495 = vmatprep.subr.mxu0 %v2763_v11  ;;  %v2768_v48 = vand.u32 4294901760, %v2767_v17  ;;  %v2769_v22 = vand.u32 4294901760, %v2226_v21  ;;  %v2775_v21 = vand.u32 4294901760, %v2276_v36  ;;  %v2782_v36 = vld [vmem:[#allocation37_spill] sm:$0xff] }
  0xbb   : > { %1525 = vmatprep.subr.mxu1 %v2723_v34  ;;  %1496 = vmatpush3.msra.mxu0 %v2764_v15  ;;  %v2783_v1 = vand.u32 4294901760, %v2782_v36 }
  0xbc   : > { %1526 = vmatpush3.msra.mxu1 %v2724_v61  ;;  %1497 = vmatprep.subr.mxu0 %v2765_v16 }
  0xbd   : > { %1527 = vmatprep.subr.mxu1 %v2766_v42  ;;  %1498 = vmatpush3.msra.mxu0 %v2768_v48 }
  0xbe   : > { %1528 = vmatpush3.msra.mxu1 %v2727_v56  ;;  %1499 = vmatprep.subr.mxu0 %v2769_v22  ;;  %v2787_v56 = vld [vmem:[#allocation26_spill] sm:$0xff] }
  0xbf   : > { %1529 = vmatprep.subr.mxu1 %v2728_v12  ;;  %1500 = vmatpush3.msra.mxu0 %v2771_v54  ;;  %v2784_v12 = vld [vmem:[#allocation34_spill] sm:$0xff] }
  0xc0   : > { %1530 = vmatpush3.msra.mxu1 %v2729_v44  ;;  %1501 = vmatprep.subr.mxu0 %v2772_v57 }
  0xc1   : > { %1531 = vmatprep.subr.mxu1 %v2730_v38  ;;  %1502 = vmatpush3.msra.mxu0 %v2774_v6  ;;  %v2780_v38 = vand.u32 4294901760, %v2319_v7 }
  0xc2   : > { %1532 = vmatpush3.msra.mxu1 %v2731_v29  ;;  %1503 = vmatprep.subr.mxu0 %v2775_v21  ;;  %v261_v29 = vstv %s260_s24 }
  0xc3   : > { %1533 = vmatprep.subr.mxu1 %v2732_v26  ;;  %1504 = vmatpush3.msra.mxu0 %v2776_v27 }
  0xc4   : > { %1534 = vmatpush3.msra.mxu1 %v2733_v13  ;;  %1505 = vmatprep.subr.mxu0 %v2777_v55  ;;  %v2785_v13 = vld [vmem:[#allocation25_spill] sm:$0xff] }
  0xc5   : > { %1535 = vmatprep.subr.mxu1 %v2734_v47  ;;  %1506 = vmatpush3.msra.mxu0 %v2778_v58 }
  0xc6   : > { %1536 = vmatpush3.msra.mxu1 %v2779_v32  ;;  %1507 = vmatprep.subr.mxu0 %v2780_v38 }
  0xc7   : > { %1537 = vmatprep.subr.mxu1 %v2781_v2  ;;  %1508 = vmatpush3.msra.mxu0 %v2783_v1 }
  0xc8   : > { %1055 = vmatprep.mubr.f32.mxu0 %v2784_v12  ;;  %1538 = vmatpush3.msra.mxu1 %v2785_v13 }
  0xc9   : > { %1057 = vmatmul.mubr.f32.vlgmr.msra.gmra.mxu0 %v2786_v37  ;;  %1539 = vmatprep.subr.mxu1 %v2787_v56 }
  0xca   : > { %1540 = vmatpush3.msra.mxu1 %v2738_v33  ;;  %1062 = vmatprep.mubr.f32.mxu0 %v2348_v51 }
  0xcb   : > { %1541 = vmatprep.subr.mxu1 %v2740_v39  ;;  %1166 = vmatprep.mubr.f32.mxu1 %v2784_v12 }
  0xcc   : > { %1542 = vmatpush3.msra.mxu1 %v2743_v19 }
  0xcd   : > { %1064 = vmatmul.mubr.f32.gmra.mxu0 %v2354_v20  ;;  %1543 = vmatprep.subr.mxu1 %v2744_v18 }
  0xce   : > { %1544 = vmatpush3.msra.mxu1 %v2202_v41 }
  0xcf   : > { %1545 = vmatprep.subr.mxu1 %v2216_v52 }
  0xd0   : > { %1546 = vmatpush3.msra.mxu1 %v2234_v24 }
  0xd1   : > { %1168 = vmatmul.mubr.f32.vlgmr.msra.gmra.mxu1 %v2786_v37 }
  0xd2   : > { %1173 = vmatprep.mubr.f32.mxu1 %v2348_v51 }
  0xd5   : > { %1175 = vmatmul.mubr.f32.gmra.mxu1 %v2354_v20 }
 0x142   : > { %v1357_v14 = vpop.f32.mrf.mxu0 }
 0x144   : > { %v1358_v7 = vpop.f32.mrf.mxu0 }
 0x145   : > { %v1359_v24 = vadd.f32 %v1358_v7, %v1357_v14 }
 0x147   : > { %v371_v20 = vadd.f32 %v1359_v24, %v261_v29 }
 0x14a   : > { %v1395_v19 = vpop.f32.mrf.mxu1 }
 0x14c   : > { %v1396_v44 = vpop.f32.mrf.mxu1 }
 0x14d   : > { %v1397_v33 = vadd.f32 %v1396_v44, %v1395_v19 }
 0x14f   : > { %v618_v43 = vadd.f32 %v1397_v33, %v371_v20 }
 0x15f   : > { %v1360_v49 = vpop.f32.mrf.mxu0 }
 0x161   : > { %v1361_v30 = vpop.f32.mrf.mxu0 }
 0x162   : > { %v1362_v51 = vadd.f32 %v1361_v30, %v1360_v49 }
 0x164   : > { %v1433_v26 = vpop.f32.mrf.mxu0  ;;  %v386_v25 = vadd.f32 %v1362_v51, %v261_v29 }
 0x166   : > { %v1434_v41 = vpop.f32.mrf.mxu0 }
 0x167   : > { %v1435_v31 = vadd.f32 %v1434_v41, %v1433_v26 }
 0x168   : > { %v1398_v34 = vpop.f32.mrf.mxu1 }
 0x169   : > { %v763_v45 = vadd.f32 %v1435_v31, %v618_v43 }
 0x16a   : > { %v1399_v61 = vpop.f32.mrf.mxu1 }
 0x16b   : > { %v1436_v52 = vpop.f32.mrf.mxu0  ;;  %v1400_v62 = vadd.f32 %v1399_v61, %v1398_v34 }
 0x16d   : > { %v1437_v47 = vpop.f32.mrf.mxu0  ;;  %v625_v59 = vadd.f32 %v1400_v62, %v386_v25 }
 0x16e   : > { %v1438_v28 = vadd.f32 %v1437_v47, %v1436_v52 }
 0x16f   : > { %v1471_v53 = vpop.f32.mrf.mxu1 }
 0x170   : > { %v772_v10 = vadd.f32 %v1438_v28, %v625_v59 }
 0x171   : > { %v1472_v39 = vpop.f32.mrf.mxu1 }
 0x172   : > { %v1473_v46 = vadd.f32 %v1472_v39, %v1471_v53 }
 0x174   : > { %v1474_v18 = vpop.f32.mrf.mxu1  ;;  %v880_v5 = vadd.f32 %v1473_v46, %v763_v45 }
 0x176   : > { %v1475_v40 = vpop.f32.mrf.mxu1 }
 0x177   : > { %v1476_v9 = vadd.f32 %v1475_v40, %v1474_v18 }
 0x179   : > { %v891_v17 = vadd.f32 %v1476_v9, %v772_v10 }
 0x189   : > { %v1509_v50 = vpop.f32.mrf.mxu0 }
 0x18b   : > { %v1510_v23 = vpop.f32.mrf.mxu0 }
 0x18c   : > { %v1511_v3 = vadd.f32 %v1510_v23, %v1509_v50 }
 0x18d   : > { %v1512_v35 = vpop.f32.mrf.mxu0 }
 0x18e   : > { %v1059_v11 = vadd.f32 %v1511_v3, %v880_v5 }
 0x18f   : > { %v1513_v0 = vpop.f32.mrf.mxu0 }
 0x190   : > { %v1514_v15 = vadd.f32 %v1513_v0, %v1512_v35 }
 0x191   : > { %v1547_v4 = vpop.f32.mrf.mxu1 }
 0x192   : > { %v1066_v60 = vadd.f32 %v1514_v15, %v891_v17 }
 0x193   : > { %v1548_v8 = vpop.f32.mrf.mxu1 }
 0x194   : > { %v1549_v16 = vadd.f32 %v1548_v8, %v1547_v4 }
 0x195   : > { %v1550_v42 = vpop.f32.mrf.mxu1 }
 0x196   : > { %v1170_v48 = vadd.f32 %v1549_v16, %v1059_v11 }
 0x197   : > { %v1551_v22 = vpop.f32.mrf.mxu1 }
 0x198   : > { %v1180_v54 = vsub.f32 0.0, %v1170_v48  ;;  %v1552_v57 = vadd.f32 %v1551_v22, %v1550_v42 }
 0x19a   : > { %v1182_v63 = vmul.f32 1.442695, %v1180_v54  ;;  %v1177_v6 = vadd.f32 %v1552_v57, %v1066_v60 }
 0x19c   : > { %1609 = vpow2.f32 %v1182_v63  ;;  %v1181_v21 = vsub.f32 0.0, %v1177_v6 }
 0x19e   : > { %v1184_v27 = vmul.f32 1.442695, %v1181_v21 }
 0x1a0   : > { %1611 = vpow2.f32 %v1184_v27 }
 0x1a9   : > { %v1610_v55 = vpop.eup %1609 }
 0x1aa   : > { %v1186_v58 = vadd.f32 1.0, %v1610_v55 }
 0x1ac   : > { %1613 = vrcp.f32 %v1186_v58 }
 0x1ad   : > { %v1612_v32 = vpop.eup %1611 }
 0x1ae   : > { %v1187_v38 = vadd.f32 1.0, %v1612_v32 }
 0x1b0   : > { %1615 = vrcp.f32 %v1187_v38 }
 0x1b9   : > { %v1614_v2 = vpop.eup %1613 }
 0x1ba   : > { %1190 = vst [vmem:[%s212_s12] sm:$0xff] %v1614_v2  ;;  %1199 = sbr.rel (!%p2788_p4) target bundleno = 474 (0x1da), region = 44 }
 0x1bd   : > { %v1616_v36 = vpop.eup %1615 }
 0x1be   : > { %1191 = vst [vmem:[%s212_s12 + $0x8] sm:$0xff] %v1616_v36 }
 0x1bf   : > { %s2798_s30 = smov (!%p1202_p13, %s1201_s30), 2 }
 0x1c0   : > { %s2546_s7 = sshll.u32 %s2798_s30, 7 }
 0x1c1   : > { %s1206_s8 = ssub.s32 256, %s2546_s7 }
 0x1c2   : > { %1207 = vsyncadd %s1193_s18, %s1206_s8  ;;  %p1315_p5 = scmp.ne.s32.totalorder %s2546_s7, 0  ;;  %s1324_s9 = sshll.u32 %s1792_s0, 8 }
 0x1c3   : > { %s2556_s11 = scalar_lea.hbm %s2606_s3, %s1324_s9  ;;  %s1212_s13 = sshll.u32 %s212_s12, 4  ;;  %s2558_s13 = int_to_ptr.vmem [resolvable:$true] %s1212_s13 }
 0x1c4   : > { %s1669_s20 = scalar_lea.vmem %s2558_s13, %s2546_s7  ;;  %s1745_s21 = smov [#allocation8]  }
 0x1c5   : > { %p1670_p1 = scmp.ne.s32.totalorder %s2558_s13, %s1669_s20  ;;  %s1673_s23 = sshll.u32 %s1745_s21, 4  ;;  %s1674_s23 = int_to_ptr.vmem [resolvable:$false] %s1673_s23 }
 0x1c6   : > { %s1675_s0 = scalar_lea.vmem %s1674_s23, 512  ;;  %p1676_p3 = scmp.lt.s32.totalorder %s2558_s13, %s1674_s23 }
 0x1c7   : > { %p1671_p0 = pnand %p1670_p1, %p1315_p5  ;;  %p1677_p8 = scmp.lt.s32.totalorder %s1675_s0, %s1669_s20 }
 0x1c9   : > { %p1672_p7 = pneg %p1671_p0  ;;  %p1678_p9 = por %p1677_p8, %p1676_p3 }
 0x1cb   : > { %p1679_p6 = pnand %p1678_p9, %p1672_p7 }
 0x1cd   : > { %1682 = shalt.err (!%p1679_p6)
}
 0x1ce   : > { %s1683_s4 = scalar_lea.hbm %s2556_s11, %s2546_s7  ;;  %s1687_s24 = scalar_lea.hbm %s2606_s3, 384 }
 0x1cf   : > { %p1684_p11 = scmp.ne.s32.totalorder %s2556_s11, %s1683_s4  ;;  %p1688_p10 = scmp.lt.s32.totalorder %s2556_s11, %s2606_s3 }
 0x1d0   : > { %p1689_p4 = scmp.lt.s32.totalorder %s1687_s24, %s1683_s4 }
 0x1d1   : > { %p1685_p12 = pnand %p1684_p11, %p1315_p5 }
 0x1d2   : > { %p1690_p13 = por %p1689_p4, %p1688_p10 }
 0x1d3   : > { %p1686_p2 = pneg %p1685_p12 }
 0x1d5   : > { %p1691_p1 = pnand %p1690_p13, %p1686_p2 }
 0x1d7   : > { %1694 = shalt.err (!%p1691_p1)
}
 0x1d8   : > { %s1746_s29 = smov 128   ;;  %s1747_s30 = smov 8  }
 0x1d9   : > { %1218 = dma.vmem_to_hbm [thread:$0]  (%p1315_p5), %s2558_s13, %s2546_s7, %s2556_s11, %s1193_s18, %s1746_s29, %s1746_s29, %s1747_s30  }
 0x1da PF: > { %s1227_s8 = sand.u32 1, %s1725_s14   ;;  %p2789_p0 = scmp.ne.s32.totalorder %s2684_s26, 0 }
 0x1db   : > { %p2790_p7 = scmp.ge.s32.totalorder %s1737_s17, 2  ;;  %s1228_s9 = scalar_lea.sflag [#allocation5], %s1227_s8 }
 0x1dd   : > { %p1564_p3 = pnand %p2790_p7, %p2789_p0 }
 0x1df   : > { %p1565_p8 = pneg %p1564_p3 }
 0x1e1   : > { %1720 = dma.done.wait (%p1565_p8), %s1228_s9, 256  }
 0x1e2   : > { %1722 = vsyncadd (%p1565_p8), %s1228_s9, 4294967040  ;;  %p18_p9 = scmp.ge.s32.totalorder %s1796_s19, 4   ;;  %s2791_s14 = smov %s1729_s15 }
 0x1e3   : > { %s2792_s15 = smov %s1733_s16  ;;  %s2793_s16 = smov %s1808_s22 }
 0x1e4   : > { %s2794_s17 = smov %s1796_s19  ;;  %20 = sbr.rel (!%p18_p9) target bundleno = 8 (0x8), region = 81 }
 0x1e9   :  { %1233 = vsyncpa [#allocation4], 1 }
 0x1ea   :  { %1235 = vsyncpa [#allocation4 + $0x1], 1 }
 0x1eb   :  { %1236 = vsyncpa [#allocation7], 1 }
 0x1ec   :  { %1237 = vsyncpa [#allocation5], 1 }
 0x1ed   :  { %1239 = vsyncpa [#allocation5 + $0x1], 1 }

</bundles_post_ra>
